<compile_context>
chip_gen: v5e
topology: v5e:2x2
jax: 0.10.0
libtpu: 0.0.40
codegen_flags: <defaults>
</compile_context>

<pallas_src>
import functools

import jax
import jax.numpy as jnp
from jax.experimental import pallas as pl
from jax.experimental.pallas import tpu as pltpu


def _add_layernorm_kernel(x_ref, y_ref, gamma_ref, beta_ref, o_ref, *, eps):
    """Fused residual-add + LayerNorm over the flattened normalized axis.

    x_ref, y_ref, o_ref: (B, N) with N = S*E (the LayerNorm normalized slab).
    gamma_ref, beta_ref: (1, N).
    """
    # Residual add (dropout is identity in eval mode). Compute in f32.
    z = x_ref[...].astype(jnp.float32) + y_ref[...].astype(jnp.float32)

    # LayerNorm statistics over the whole normalized slab, per batch row.
    mean = jnp.mean(z, axis=-1, keepdims=True)
    c = z - mean
    var = jnp.mean(c * c, axis=-1, keepdims=True)
    inv = jax.lax.rsqrt(var + eps)

    # Affine params loaded / broadcast exactly once.
    gamma = gamma_ref[...]
    beta = beta_ref[...]

    o_ref[...] = (c * inv * gamma + beta).astype(o_ref.dtype)


def add_norm_pallas(X, Y, gamma, beta, eps=1e-5):
    """AddNorm.forward(X, y): LayerNorm_{(S,E)}(dropout(y) + X), eval mode."""
    B, S, E = X.shape
    N = S * E

    # Flatten the normalized (S, E) slab into a single lane-dense axis.
    x2 = X.reshape(B, N)
    y2 = Y.reshape(B, N)
    g2 = gamma.reshape(1, N)
    b2 = beta.reshape(1, N)

    vmem_spec = functools.partial(pl.BlockSpec, memory_space=pltpu.MemorySpace.VMEM)

    out = pl.pallas_call(
        functools.partial(_add_layernorm_kernel, eps=eps),
        out_shape=jax.ShapeDtypeStruct((B, N), X.dtype),
        in_specs=[vmem_spec(), vmem_spec(), vmem_spec(), vmem_spec()],
        out_specs=vmem_spec(),
    )(x2, y2, g2, b2)

    return out.reshape(B, S, E)


def _reference_addnorm(X, Y, gamma, beta, eps=1e-5):
    """Pure-JAX reference mirroring PyTorch AddNorm (eval mode),
    LayerNorm(normalized_shape=[S, E])."""
    z = X + Y
    mean = jnp.mean(z, axis=(1, 2), keepdims=True)
    var = jnp.mean((z - mean) ** 2, axis=(1, 2), keepdims=True)
    return (z - mean) / jnp.sqrt(var + eps) * gamma + beta


if __name__ == "__main__":
    # Shapes implied by the surrounding transformer code: LayerNorm([50, E]).
    B, S, E = 2, 50, 32

    key = jax.random.PRNGKey(0)
    kx, ky, kg, kb = jax.random.split(key, 4)

    X = jax.random.normal(kx, (B, S, E), dtype=jnp.float32)
    Y = jax.random.normal(ky, (B, S, E), dtype=jnp.float32)
    # Non-trivial affine params to exercise the elementwise-affine path.
    gamma = 1.0 + 0.1 * jax.random.normal(kg, (S, E), dtype=jnp.float32)
    beta = 0.1 * jax.random.normal(kb, (S, E), dtype=jnp.float32)

    out = add_norm_pallas(X, Y, gamma, beta)
    out = jax.block_until_ready(out)

    ref = _reference_addnorm(X, Y, gamma, beta)
    assert out.shape == (B, S, E)
    assert jnp.allclose(out, ref, rtol=1e-5, atol=1e-5), "mismatch vs JAX reference"

    print("KERNEL_OK")
</pallas_src>

<mosaic_0001>
module attributes {stable_mosaic.version = 11 : i64} {
  func.func @_add_layernorm_kernel(%arg0: memref<2x1600xf32, #tpu.memory_space<vmem>>, %arg1: memref<2x1600xf32, #tpu.memory_space<vmem>>, %arg2: memref<1x1600xf32, #tpu.memory_space<vmem>>, %arg3: memref<1x1600xf32, #tpu.memory_space<vmem>>, %arg4: memref<2x1600xf32, #tpu.memory_space<vmem>>) attributes {dimension_semantics = [], scalar_prefetch = 0 : i64, scratch_operands = 0 : i64, tpu.core_type = #tpu.core_type<tc>} {
    %c0 = arith.constant 0 : index
    %c0_0 = arith.constant 0 : index
    %0 = vector.load %arg0[%c0, %c0_0] : memref<2x1600xf32, #tpu.memory_space<vmem>>, vector<2x1600xf32>
    %c0_1 = arith.constant 0 : index
    %c0_2 = arith.constant 0 : index
    %1 = vector.load %arg1[%c0_1, %c0_2] : memref<2x1600xf32, #tpu.memory_space<vmem>>, vector<2x1600xf32>
    %2 = arith.addf %0, %1 : vector<2x1600xf32>
    %cst = arith.constant dense<0.000000e+00> : vector<2xf32>
    %3 = vector.multi_reduction <add>, %2, %cst [1] : vector<2x1600xf32> to vector<2xf32>
    %4 = vector.shape_cast %3 : vector<2xf32> to vector<2x1xf32>
    %cst_3 = arith.constant 1.600000e+03 : f32
    %5 = vector.broadcast %cst_3 : f32 to vector<2x1xf32>
    %6 = arith.divf %4, %5 : vector<2x1xf32>
    %7 = vector.broadcast %6 : vector<2x1xf32> to vector<2x1600xf32>
    %8 = arith.subf %2, %7 : vector<2x1600xf32>
    %9 = arith.mulf %8, %8 : vector<2x1600xf32>
    %cst_4 = arith.constant dense<0.000000e+00> : vector<2xf32>
    %10 = vector.multi_reduction <add>, %9, %cst_4 [1] : vector<2x1600xf32> to vector<2xf32>
    %11 = vector.shape_cast %10 : vector<2xf32> to vector<2x1xf32>
    %cst_5 = arith.constant 1.600000e+03 : f32
    %12 = vector.broadcast %cst_5 : f32 to vector<2x1xf32>
    %13 = arith.divf %11, %12 : vector<2x1xf32>
    %cst_6 = arith.constant 9.99999974E-6 : f32
    %14 = vector.broadcast %cst_6 : f32 to vector<2x1xf32>
    %15 = arith.addf %13, %14 : vector<2x1xf32>
    %16 = math.rsqrt %15 : vector<2x1xf32>
    %c0_7 = arith.constant 0 : index
    %c0_8 = arith.constant 0 : index
    %17 = vector.load %arg2[%c0_7, %c0_8] : memref<1x1600xf32, #tpu.memory_space<vmem>>, vector<1x1600xf32>
    %c0_9 = arith.constant 0 : index
    %c0_10 = arith.constant 0 : index
    %18 = vector.load %arg3[%c0_9, %c0_10] : memref<1x1600xf32, #tpu.memory_space<vmem>>, vector<1x1600xf32>
    %19 = vector.broadcast %16 : vector<2x1xf32> to vector<2x1600xf32>
    %20 = arith.mulf %8, %19 : vector<2x1600xf32>
    %21 = vector.broadcast %17 : vector<1x1600xf32> to vector<2x1600xf32>
    %22 = arith.mulf %20, %21 : vector<2x1600xf32>
    %23 = vector.broadcast %18 : vector<1x1600xf32> to vector<2x1600xf32>
    %24 = arith.addf %22, %23 : vector<2x1600xf32>
    %c0_11 = arith.constant 0 : index
    %c0_12 = arith.constant 0 : index
    %25 = vector.load %arg4[%c0_11, %c0_12] : memref<2x1600xf32, #tpu.memory_space<vmem>>, vector<2x1600xf32>
    tpu.vector_store %arg4[%c0_11, %c0_12], %24 {strides = array<i32>} : memref<2x1600xf32, #tpu.memory_space<vmem>>, vector<2x1600xf32>,
    return
  }
}

</mosaic_0001>

<bundles_post_ra>
// kernel: tpu_custom_call.1
= control target key start
LH: loop header
LB: loop body
LE: loop exit
PB: predicated region body
PF: predicated region fallthrough
CT: control target
= control target key end

     0   :  { %9 = vsyncpa [#allocation3], 0  ;;  %s656_s0 = inlined_call_operand.hbm [shape: f32[2,1600], index: 0, kind: input, shape index: {}]   ;;  %s657_s1 = inlined_call_operand.hbm [shape: f32[2,1600], index: 1, kind: input, shape index: {}]   ;;  %s658_s2 = inlined_call_operand.hbm [shape: f32[1,1600], index: 2, kind: input, shape index: {}]   ;;  %s659_s3 = inlined_call_operand.hbm [shape: f32[1,1600], index: 3, kind: input, shape index: {}]   ;;  %s660_s4 = inlined_call_operand.hbm [shape: f32[2,1600], index: 4, kind: output, shape index: {}]  }
   0x1   :  { %10 = vsyncpa [#allocation6], 0 }
   0x2   :  { %11 = vsyncpa [#allocation9], 0  ;;  %s29_s17 = sshll.u32 %s657_s1, 4  ;;  %s30_s17 = int_to_ptr.hbm [resolvable:$true] %s29_s17 }
   0x3   :  { %12 = vsyncpa [#allocation4], 0  ;;  %s505_s18 = smov [#allocation5]   ;;  %s18_s22 = sshll.u32 %s656_s0, 4  ;;  %s19_s22 = int_to_ptr.hbm [resolvable:$true] %s18_s22 }
   0x4   :  { %s31_s19 = sshll.u32 %s505_s18, 4  ;;  %s506_s23 = smov [#allocation2]   ;;  %s32_s19 = int_to_ptr.vmem [resolvable:$true] %s31_s19 }
   0x5   :  { %34 = dma.hbm_to_vmem [thread:$0]  %s30_s17, 416, %s32_s19, [#allocation6]  }
   0x6   :  { %s20_s24 = sshll.u32 %s506_s23, 4  ;;  %s40_s27 = sshll.u32 %s658_s2, 4  ;;  %s21_s24 = int_to_ptr.vmem [resolvable:$true] %s20_s24  ;;  %s41_s27 = int_to_ptr.hbm [resolvable:$true] %s40_s27 }
   0x7   :  { %23 = dma.hbm_to_vmem [thread:$0]  %s19_s22, 416, %s21_s24, [#allocation3]  }
   0x8   :  { %s51_s29 = sshll.u32 %s659_s3, 4  ;;  %s507_s30 = smov [#allocation7]   ;;  %s52_s29 = int_to_ptr.hbm [resolvable:$true] %s51_s29 }
   0x9   :  { %s42_s5 = sshll.u32 %s507_s30, 4  ;;  %s508_s0 = smov [#allocation8]   ;;  %s43_s5 = int_to_ptr.vmem [resolvable:$true] %s42_s5 }
   0xa   :  { %45 = dma.hbm_to_vmem [thread:$0]  %s41_s27, 208, %s43_s5, [#allocation6]  }
   0xb   :  { %s53_s6 = sshll.u32 %s508_s0, 4  ;;  %s54_s6 = int_to_ptr.vmem [resolvable:$true] %s53_s6 }
   0xc   :  { %56 = dma.hbm_to_vmem [thread:$0]  %s52_s29, 208, %s54_s6, [#allocation9]  }
   0xd   :  { %497 = dma.done.wait [#allocation3], 416  }
   0xe   :  { %498 = vsyncadd [#allocation3], 4294966880 }
   0xf   :  { %499 = dma.done.wait [#allocation6], 624  }
  0x10   :  { %500 = vsyncadd [#allocation6], 4294966672 }
  0x11   :  { %501 = dma.done.wait [#allocation9], 208  }
  0x12   :  { %502 = vsyncadd [#allocation9], 4294967088  ;;  %v73_v0 = vld [vmem:[#allocation2] sm:$0xff]  ;;  %v74_v1 = vld [vmem:[#allocation2 + $0x8] sm:$0xff]  ;;  %vm120_vm0 = vcmask 1041408   ;;  %vm144_vm1 = vcmask 517120  }
  0x13   :  { %v77_v2 = vld [vmem:[#allocation5] sm:$0xff]  ;;  %v78_v3 = vld [vmem:[#allocation5 + $0x8] sm:$0xff]  ;;  %v75_v6 = vld [vmem:[#allocation2 + $0x10] sm:$0xff]  ;;  %v509_v50 = vmov 1600.0   ;;  %v510_v56 = vmov 269488144  }
  0x14   :  { %v549_v4 = vadd.f32 %v77_v2, %v73_v0  ;;  %v551_v5 = vadd.f32 %v78_v3, %v74_v1  ;;  %v79_v7 = vld [vmem:[#allocation5 + $0x10] sm:$0xff]  ;;  %v76_v8 = vld [vmem:[#allocation2 + $0x18] sm:$0x3]  ;;  %v80_v9 = vld [vmem:[#allocation5 + $0x18] sm:$0x3]  ;;  %373 = vrcp.f32 %v509_v50  ;;  %v574_v57 = vunpack.c.l.s4 %v510_v56  ;;  %s511_s2 = smov [#allocation10]  }
  0x15   :  { %v555_v10 = vadd.f32 %v79_v7, %v75_v6  ;;  %v557_v13 = vadd.f32 %v80_v9, %v76_v8  ;;  %vm285_vm3 = vcmask 1045508   ;;  %vm287_vm6 = vcmask 1043456   ;;  %s352_s3 = sshll.u32 %s511_s2, 4  ;;  %s354_s9 = sshll.u32 %s660_s4, 4  ;;  %s353_s3 = int_to_ptr.vmem [resolvable:$true] %s352_s3  ;;  %s355_s9 = int_to_ptr.hbm [resolvable:$true] %s354_s9 }
  0x16   :  { %89 = vst [vmem:[#allocation1] ss:$4 sm:$0xff] %v549_v4  ;;  %v160_v59 = vunpack.c.0.s8 %v574_v57 }
  0x17   :  { %91 = vst [vmem:[#allocation1 + $0x20] ss:$4 sm:$0xff] %v551_v5 }
  0x1a   :  { %v374_v51 = vpop.eup %373 }
  0x1b   :  { %v150_v52 = vmul.f32 1600.0, %v374_v51  ;;  %vm154_vm2 = vweird.f32 %v374_v51 }
  0x1d   :  { %v92_v11 = vld.sshfl [vmem:[#allocation1] sm:$0xff pattern:$0x73625140]  ;;  %v93_v12 = vld.sshfl [vmem:[#allocation1 + $0x8] sm:$0xff pattern:$0x73625140] }
  0x1e   :  { %v94_v14 = vld.sshfl [vmem:[#allocation1 + $0x10] sm:$0xff pattern:$0x73625140]  ;;  %v95_v15 = vld.sshfl [vmem:[#allocation1 + $0x18] sm:$0xff pattern:$0x73625140] }
  0x1f   :  { %v96_v16 = vld.sshfl [vmem:[#allocation1 + $0x20] sm:$0xff pattern:$0x73625140]  ;;  %v97_v17 = vld.sshfl [vmem:[#allocation1 + $0x28] sm:$0xff pattern:$0x73625140] }
  0x20   :  { %v98_v18 = vld.sshfl [vmem:[#allocation1 + $0x30] sm:$0xff pattern:$0x73625140]  ;;  %v99_v19 = vld.sshfl [vmem:[#allocation1 + $0x38] sm:$0xff pattern:$0x73625140] }
  0x21   :  { %100 = vst [vmem:[#allocation1] ss:$4 sm:$0xff] %v555_v10  ;;  %v121_v20 = vsel %vm120_vm0, %v92_v11, 0.0  ;;  %v122_v21 = vsel %vm120_vm0, %v93_v12, 0.0  ;;  %v124_v22 = vsel %vm120_vm0, %v94_v14, 0.0  ;;  %v126_v24 = vsel %vm120_vm0, %v95_v15, 0.0 }
  0x22   :  { %101 = vst [vmem:[#allocation1 + $0x20] ss:$4 sm:$0xff] %v557_v13  ;;  %v123_v23 = vadd.f32 %v122_v21, %v121_v20  ;;  %v128_v26 = vsel %vm120_vm0, %v96_v16, 0.0  ;;  %v130_v28 = vsel %vm120_vm0, %v97_v17, 0.0  ;;  %v132_v30 = vsel %vm120_vm0, %v98_v18, 0.0 }
  0x23   :  { %v134_v33 = vsel %vm120_vm0, %v99_v19, 0.0  ;;  %v151_v53 = vsub.f32 1.0, %v150_v52 }
  0x24   :  { %v125_v25 = vadd.f32 %v124_v22, %v123_v23 }
  0x25   :  { %v152_v54 = vmul.f32 %v374_v51, %v151_v53 }
  0x26   :  { %v127_v27 = vadd.f32 %v126_v24, %v125_v25 }
  0x27   :  { %v153_v55 = vadd.f32 %v374_v51, %v152_v54 }
  0x28   :  { %v129_v29 = vadd.f32 %v128_v26, %v127_v27  ;;  %v102_v31 = vld.sshfl [vmem:[#allocation1] sm:$0xff pattern:$0x73625140]  ;;  %v103_v34 = vld.sshfl [vmem:[#allocation1 + $0x8] sm:$0xff pattern:$0x73625140] }
  0x29   :  { %v136_v36 = vsel %vm120_vm0, %v102_v31, 0.0  ;;  %v104_v37 = vld.sshfl [vmem:[#allocation1 + $0x10] sm:$0xff pattern:$0x73625140]  ;;  %v138_v39 = vsel %vm120_vm0, %v103_v34, 0.0  ;;  %v155_v58 = vsel %vm154_vm2, %v374_v51, %v153_v55 }
  0x2a   :  { %v131_v32 = vadd.f32 %v130_v28, %v129_v29  ;;  %v105_v40 = vld.sshfl [vmem:[#allocation1 + $0x18] sm:$0xff pattern:$0x73625140]  ;;  %v140_v42 = vsel %vm120_vm0, %v104_v37, 0.0 }
  0x2b   :  { %v106_v43 = vld.sshfl [vmem:[#allocation1 + $0x20] sm:$0xff pattern:$0x73625140]  ;;  %v142_v45 = vsel %vm120_vm0, %v105_v40, 0.0 }
  0x2c   :  { %v133_v35 = vadd.f32 %v132_v30, %v131_v32  ;;  %v145_v47 = vsel %vm144_vm1, %v106_v43, 0.0 }
  0x2e   :  { %v135_v38 = vadd.f32 %v134_v33, %v133_v35 }
  0x30   :  { %v137_v41 = vadd.f32 %v136_v36, %v135_v38 }
  0x32   :  { %v139_v44 = vadd.f32 %v138_v39, %v137_v41 }
  0x34   :  { %v141_v46 = vadd.f32 %v140_v42, %v139_v44 }
  0x36   :  { %v143_v48 = vadd.f32 %v142_v45, %v141_v46 }
  0x38   :  { %v146_v49 = vadd.f32 %v145_v47, %v143_v48  ;;  %v245_v48 = vld [vmem:[#allocation7] sm:$0xff] }
  0x39   :  { %v262_v50 = vperm.slane %v245_v48, 1  ;;  %v263_v51 = vperm.slane %v245_v48, 2  ;;  %v264_v52 = vperm.slane %v245_v48, 3  ;;  %v266_v53 = vperm.slane %v245_v48, 5 }
  0x3a   :  { %147 = vadd.xlane.f32.xlu0 %v146_v49  ;;  %v612_v49 = vld [vmem:[#allocation7 + $0x8] sm:$0x1f]  ;;  %v267_v54 = vperm.slane %v245_v48, 6  ;;  %v268_v55 = vperm.slane %v245_v48, 7 }
  0x3b   :  { %v270_v56 = vperm.slane %v612_v49, 1 }
  0xad   :  { %v148_v60 = vpop.xlane.xlu0 %147 }
  0xae   :  { %v156_v61 = vmul.f32 %v155_v58, %v148_v60  ;;  %v271_v60 = vperm.slane %v612_v49, 2 }
  0xb0   :  { %v161_v62 = vperm.slane %v156_v61, %v160_v59  ;;  %v261_v61 = vperm.slane %v245_v48, 0 }
  0xb2   :  { %v580_v63 = vsub.f32 %v549_v4, %v161_v62  ;;  %v583_v0 = vsub.f32 %v551_v5, %v161_v62  ;;  %v590_v3 = vsub.f32 %v555_v10, %v161_v62  ;;  %v593_v6 = vsub.f32 %v557_v13, %v161_v62 }
  0xb3   :  { %v272_v62 = vperm.slane %v612_v49, 3 }
  0xb4   :  { %v167_v1 = vmul.f32 %v580_v63, %v580_v63  ;;  %v168_v2 = vmul.f32 %v583_v0, %v583_v0  ;;  %v169_v5 = vmul.f32 %v590_v3, %v590_v3  ;;  %v170_v14 = vmul.f32 %v593_v6, %v593_v6 }
  0xb6   :  { %177 = vst [vmem:[#allocation1 + $0x20] ss:$4 sm:$0xff] %v168_v2  ;;  %v269_v2 = vperm.slane %v612_v49, 0 }
  0xb7   :  { %175 = vst [vmem:[#allocation1] ss:$4 sm:$0xff] %v167_v1  ;;  %v247_v1 = vld [vmem:[#allocation8] sm:$0xff] }
  0xbd   :  { %v182_v7 = vld.sshfl [vmem:[#allocation1 + $0x20] sm:$0xff pattern:$0x73625140]  ;;  %v183_v4 = vld.sshfl [vmem:[#allocation1 + $0x28] sm:$0xff pattern:$0x73625140] }
  0xbe   :  { %v178_v8 = vld.sshfl [vmem:[#allocation1] sm:$0xff pattern:$0x73625140]  ;;  %v179_v9 = vld.sshfl [vmem:[#allocation1 + $0x8] sm:$0xff pattern:$0x73625140] }
  0xbf   :  { %v180_v11 = vld.sshfl [vmem:[#allocation1 + $0x10] sm:$0xff pattern:$0x73625140]  ;;  %v181_v12 = vld.sshfl [vmem:[#allocation1 + $0x18] sm:$0xff pattern:$0x73625140] }
  0xc0   :  { %v184_v15 = vld.sshfl [vmem:[#allocation1 + $0x30] sm:$0xff pattern:$0x73625140]  ;;  %v185_v16 = vld.sshfl [vmem:[#allocation1 + $0x38] sm:$0xff pattern:$0x73625140] }
  0xc1   :  { %186 = vst [vmem:[#allocation1] ss:$4 sm:$0xff] %v169_v5  ;;  %v206_v10 = vsel %vm120_vm0, %v178_v8, 0.0  ;;  %v207_v13 = vsel %vm120_vm0, %v179_v9, 0.0  ;;  %v209_v18 = vsel %vm120_vm0, %v180_v11, 0.0  ;;  %v211_v20 = vsel %vm120_vm0, %v181_v12, 0.0 }
  0xc2   :  { %187 = vst [vmem:[#allocation1 + $0x20] ss:$4 sm:$0xff] %v170_v14  ;;  %v208_v17 = vadd.f32 %v207_v13, %v206_v10  ;;  %v213_v22 = vsel %vm120_vm0, %v182_v7, 0.0  ;;  %v215_v24 = vsel %vm120_vm0, %v183_v4, 0.0  ;;  %v217_v26 = vsel %vm120_vm0, %v184_v15, 0.0 }
  0xc3   :  { %v219_v29 = vsel %vm120_vm0, %v185_v16, 0.0  ;;  %v273_v7 = vperm.slane %v612_v49, 4  ;;  %v275_v4 = vrot.slane %v262_v50, 6  ;;  %v276_v9 = vrot.slane %v263_v51, 4  ;;  %v619_v15 = vld [vmem:[#allocation8 + $0x8] sm:$0x1f] }
  0xc4   :  { %v210_v19 = vadd.f32 %v209_v18, %v208_v17  ;;  %v277_v5 = vrot.slane %v264_v52, 2  ;;  %v278_v11 = vrot.slane %v266_v53, 6  ;;  %v279_v12 = vrot.slane %v267_v54, 4 }
  0xc5   :  { %v280_v16 = vrot.slane %v268_v55, 2  ;;  %v281_v10 = vrot.slane %v270_v56, 6  ;;  %v282_v13 = vrot.slane %v271_v60, 4  ;;  %v283_v17 = vrot.slane %v272_v62, 2 }
  0xc6   :  { %v212_v21 = vadd.f32 %v211_v20, %v210_v19  ;;  %v305_v18 = vperm.slane %v247_v1, 1  ;;  %v306_v19 = vperm.slane %v247_v1, 2  ;;  %v307_v20 = vperm.slane %v247_v1, 3 }
  0xc7   :  { %v293_v50 = vsel %vm285_vm3, %v282_v13, %v283_v17 }
  0xc8   :  { %v214_v23 = vadd.f32 %v213_v22, %v212_v21  ;;  %v188_v27 = vld.sshfl [vmem:[#allocation1] sm:$0xff pattern:$0x73625140]  ;;  %v189_v30 = vld.sshfl [vmem:[#allocation1 + $0x8] sm:$0xff pattern:$0x73625140]  ;;  %v284_v22 = vsel %vm120_vm0, %v261_v61, %v275_v4 }
  0xc9   :  { %v221_v32 = vsel %vm120_vm0, %v188_v27, 0.0  ;;  %v190_v33 = vld.sshfl [vmem:[#allocation1 + $0x10] sm:$0xff pattern:$0x73625140]  ;;  %v223_v35 = vsel %vm120_vm0, %v189_v30, 0.0  ;;  %v314_v27 = vperm.slane %v619_v15, 2 }
  0xca   :  { %v216_v25 = vadd.f32 %v215_v24, %v214_v23  ;;  %v191_v36 = vld.sshfl [vmem:[#allocation1 + $0x18] sm:$0xff pattern:$0x73625140]  ;;  %v225_v38 = vsel %vm120_vm0, %v190_v33, 0.0  ;;  %v309_v23 = vperm.slane %v247_v1, 5  ;;  %v310_v24 = vperm.slane %v247_v1, 6 }
  0xcb   :  { %v192_v39 = vld.sshfl [vmem:[#allocation1 + $0x20] sm:$0xff pattern:$0x73625140]  ;;  %v227_v41 = vsel %vm120_vm0, %v191_v36, 0.0  ;;  %v304_v30 = vperm.slane %v247_v1, 0  ;;  %v318_v33 = vrot.slane %v305_v18, 6 }
  0xcc   :  { %v218_v28 = vadd.f32 %v217_v26, %v216_v25  ;;  %v229_v43 = vsel %vm144_vm1, %v192_v39, 0.0  ;;  %v311_v25 = vperm.slane %v247_v1, 7  ;;  %v313_v26 = vperm.slane %v619_v15, 1 }
  0xcd   :  { %v327_v52 = vsel %vm120_vm0, %v304_v30, %v318_v33 }
  0xce   :  { %v220_v31 = vadd.f32 %v219_v29, %v218_v28  ;;  %v315_v28 = vperm.slane %v619_v15, 3  ;;  %v323_v39 = vrot.slane %v311_v25, 2 }
  0xd0   :  { %v222_v34 = vadd.f32 %v221_v32, %v220_v31  ;;  %v308_v31 = vperm.slane %v247_v1, 4  ;;  %v312_v32 = vperm.slane %v619_v15, 0 }
  0xd2   :  { %v224_v37 = vadd.f32 %v223_v35, %v222_v34  ;;  %v319_v34 = vrot.slane %v306_v19, 4  ;;  %v320_v35 = vrot.slane %v307_v20, 2 }
  0xd4   :  { %v226_v40 = vadd.f32 %v225_v38, %v224_v37  ;;  %v321_v37 = vrot.slane %v309_v23, 6  ;;  %v322_v38 = vrot.slane %v310_v24, 4  ;;  %v328_v53 = vsel %vm285_vm3, %v319_v34, %v320_v35 }
  0xd6   :  { %v228_v42 = vadd.f32 %v227_v41, %v226_v40  ;;  %v324_v40 = vrot.slane %v313_v26, 6  ;;  %v325_v41 = vrot.slane %v314_v27, 4  ;;  %v330_v54 = vsel %vm120_vm0, %v308_v31, %v321_v37 }
  0xd7   :  { %v331_v55 = vsel %vm285_vm3, %v322_v38, %v323_v39 }
  0xd8   :  { %v230_v44 = vadd.f32 %v229_v43, %v228_v42  ;;  %v326_v42 = vrot.slane %v315_v28, 2  ;;  %v333_v56 = vsel %vm120_vm0, %v312_v32, %v324_v40 }
  0xda   :  { %231 = vadd.xlane.f32.xlu0 %v230_v44  ;;  %v334_v60 = vsel %vm285_vm3, %v325_v41, %v326_v42 }
 0x14d   :  { %v232_v45 = vpop.xlane.xlu0 %231 }
 0x14e   :  { %v233_v46 = vmul.f32 %v232_v45, %v155_v58  ;;  %v265_v58 = vperm.slane %v245_v48, 4  ;;  %v286_v45 = vsel %vm285_vm3, %v276_v9, %v277_v5  ;;  %v292_v48 = vsel %vm120_vm0, %v269_v2, %v281_v10 }
 0x14f   :  { %v288_v61 = vsel %vm287_vm6, %v284_v22, %v286_v45  ;;  %v294_v1 = vsel %vm287_vm6, %v292_v48, %v293_v50  ;;  %v332_v9 = vsel %vm287_vm6, %v330_v54, %v331_v55  ;;  %v335_v5 = vsel %vm287_vm6, %v333_v56, %v334_v60 }
 0x150   :  { %v234_v47 = vadd.f32 1e-05, %v233_v46  ;;  %v289_v44 = vsel %vm120_vm0, %v265_v58, %v278_v11  ;;  %v290_v46 = vsel %vm285_vm3, %v279_v12, %v280_v16 }
 0x151   :  { %v291_v62 = vsel %vm287_vm6, %v289_v44, %v290_v46 }
 0x152   :  { %375 = vrsqrt.f32 %v234_v47  ;;  %vm241_vm5 = vweird.f32 %v234_v47 }
 0x158   :  { %v376_v8 = vpop.eup %375 }
 0x159   :  { %v236_v14 = vmul.f32 %v376_v8, %v234_v47  ;;  %vm242_vm4 = vweird.f32 %v376_v8 }
 0x15a   :  { %vm243_vm7 = vmor %vm241_vm5, %vm242_vm4 }
 0x15b   :  { %v237_v21 = vmul.f32 %v376_v8, %v236_v14 }
 0x15d   :  { %v238_v29 = vmul.f32 0.5, %v237_v21 }
 0x15f   :  { %v239_v36 = vsub.f32 1.5, %v238_v29 }
 0x161   :  { %v240_v43 = vmul.f32 %v376_v8, %v239_v36 }
 0x163   :  { %v244_v51 = vsel %vm243_vm7, %v376_v8, %v240_v43  ;;  %v329_v8 = vsel %vm287_vm6, %v327_v52, %v328_v53 }
 0x164   :  { %v253_v47 = vperm.slane %v244_v51, %v160_v59  ;;  %v316_v59 = vperm.slane %v619_v15, 4 }
 0x166   :  { %v258_v58 = vmul.f32 %v253_v47, %v593_v6  ;;  %v255_v2 = vmul.f32 %v253_v47, %v580_v63  ;;  %v256_v4 = vmul.f32 %v253_v47, %v583_v0  ;;  %v257_v57 = vmul.f32 %v253_v47, %v590_v3 }
 0x168   :  { %v298_v11 = vmul.f32 %v288_v61, %v255_v2  ;;  %v299_v12 = vmul.f32 %v291_v62, %v256_v4  ;;  %v300_v14 = vmul.f32 %v294_v1, %v257_v57  ;;  %v301_v6 = vmul.f32 %v273_v7, %v258_v58 }
 0x16a   :  { %v339_v16 = vadd.f32 %v329_v8, %v298_v11  ;;  %v340_v63 = vadd.f32 %v332_v9, %v299_v12  ;;  %v341_v10 = vadd.f32 %v335_v5, %v300_v14  ;;  %v342_v0 = vadd.f32 %v316_v59, %v301_v6 }
 0x16c   :  { %343 = vst [vmem:[#allocation10] sm:$0xff] %v339_v16 }
 0x16d   :  { %344 = vst [vmem:[#allocation10 + $0x8] sm:$0xff] %v340_v63 }
 0x16e   :  { %345 = vst [vmem:[#allocation10 + $0x10] sm:$0xff] %v341_v10 }
 0x16f   :  { %346 = vst.msk [vmem:[#allocation10 + $0x18] sm:$0x3] %vm144_vm1, %v342_v0 }
 0x170   :  { %357 = dma.vmem_to_hbm [thread:$0]  %s353_s3, 416, %s355_s9, [#allocation4]  }
 0x171   :  { %503 = dma.done.wait [#allocation4], 416  }
 0x172   :  { %504 = vsyncadd [#allocation4], 4294966880 }
 0x173   :  { %362 = vsyncpa [#allocation3], 1 }
 0x174   :  { %363 = vsyncpa [#allocation6], 1 }
 0x175   :  { %364 = vsyncpa [#allocation9], 1 }
 0x176   :  { %365 = vsyncpa [#allocation4], 1 }

</bundles_post_ra>
